<compile_context>
chip_gen: v7x
topology: tpu7x:2x2x1
jax: 0.10.0
libtpu: 0.0.40
codegen_flags: <defaults>
</compile_context>

<pallas_src>
import math
from functools import reduce
from operator import mul

import jax
import jax.numpy as jnp
from jax.experimental import pallas as pl
from jax.experimental.pallas import tpu as pltpu


def _prompt_copy_kernel(p_ref, o_ref, sem):
    # forward() is an exact identity: one direct HBM->HBM DMA of the whole
    # prompts tensor.  No VMEM staging, no vector load/store work.
    cp = pltpu.make_async_copy(p_ref, o_ref, sem)
    cp.start()
    cp.wait()


def prompt_forward(prompts: jax.Array) -> jax.Array:
    """Pallas equivalent of Prompt.forward(): returns the prompts tensor.

    prompts: (depth, num_prompt, embed_dim)
    """
    nbytes = prompts.size * prompts.dtype.itemsize

    return pl.pallas_call(
        _prompt_copy_kernel,
        out_shape=jax.ShapeDtypeStruct(prompts.shape, prompts.dtype),
        # Raw HBM refs on both sides -> the kernel issues a single HBM->HBM DMA.
        in_specs=[pl.BlockSpec(memory_space=pl.ANY)],
        out_specs=pl.BlockSpec(memory_space=pl.ANY),
        scratch_shapes=[pltpu.SemaphoreType.DMA(())],
        cost_estimate=pl.CostEstimate(
            flops=0, transcendentals=0, bytes_accessed=2 * nbytes
        ),
    )(prompts)


def init_prompts(key, depth, num_prompt, embed_dim, patch_size, dtype=jnp.float32):
    """Deterministic parameter init matching Prompt._init_prompt()."""
    val = math.sqrt(6.0 / float(3 * reduce(mul, patch_size, 1) + embed_dim))
    return jax.random.uniform(
        key, (depth, num_prompt, embed_dim), dtype=dtype, minval=-val, maxval=val
    )


if __name__ == "__main__":
    # Small shapes consistent with the module:
    depth = 4
    num_prompt = 8
    embed_dim = 32
    patch_size = (16, 16)

    key = jax.random.PRNGKey(0)
    prompts = init_prompts(key, depth, num_prompt, embed_dim, patch_size)

    out = prompt_forward(prompts)
    out = jax.block_until_ready(out)

    # Correctness check: forward() must return the parameter exactly.
    assert out.shape == (depth, num_prompt, embed_dim)
    assert out.dtype == prompts.dtype
    assert bool(jnp.array_equal(out, prompts))

    print("KERNEL_OK")
</pallas_src>

<mosaic_0001>
module attributes {stable_mosaic.version = 11 : i64} {
  func.func @_prompt_copy_kernel(%arg0: memref<4x8x32xf32, #tpu.memory_space<any>>, %arg1: memref<4x8x32xf32, #tpu.memory_space<any>>, %arg2: memref<!tpu.dma_semaphore, #tpu.memory_space<semaphore_mem>>) attributes {dimension_semantics = [], scalar_prefetch = 0 : i64, scratch_operands = 1 : i64, tpu.core_type = #tpu.core_type<tc>} {
    tpu.enqueue_dma source(%arg0 : memref<4x8x32xf32, #tpu.memory_space<any>>) target(%arg1 : memref<4x8x32xf32, #tpu.memory_space<any>>) target_semaphore(%arg2 : memref<!tpu.dma_semaphore, #tpu.memory_space<semaphore_mem>>)
    tpu.wait_dma2 semaphore(%arg2 : memref<!tpu.dma_semaphore, #tpu.memory_space<semaphore_mem>>) src(%arg0 : memref<4x8x32xf32, #tpu.memory_space<any>>) dst(%arg1 : memref<4x8x32xf32, #tpu.memory_space<any>>)
    return
  }
}

</mosaic_0001>

<bundles_post_ra>
// kernel: tpu_custom_call.1
= control target key start
LH: loop header
LB: loop body
LE: loop exit
PB: predicated region body
PF: predicated region fallthrough
CT: control target
= control target key end

     0   :  { %s35_s6 = smov [#allocation2]   ;;  %s36_s7 = smov [#allocation3]   ;;  %s54_s0 = inlined_call_operand.hbm [shape: f32[4,8,32], index: 0, kind: input, shape index: {}]   ;;  %s55_s1 = inlined_call_operand.hbm [shape: f32[4,8,32], index: 1, kind: output, shape index: {}]  }
   0x1   :  { %s37_s8 = smov 0  }
   0x2   :  { %18 = dma.general %s54_s0, 512, %s55_s1, %s35_s6, %s36_s7, [#allocation4], %s37_s8, 0  }
   0x3   :  { %33 = dma.done.wait [#allocation2], 512 }
   0x4   :  { %34 = vsyncadd [#allocation2], 4294966784 }
   0x5   :  { %23 = vsyncmov [#allocation2] }
   0x8   :  { %s24_s13 = vpop.sfrf %23 }
   0x9   :  { %p29_p0 = scmp.ne.s32.totalorder %s24_s13, 0 }
   0xb   :  { %28 = shalt.err (%p29_p0)  }

</bundles_post_ra>
